<compile_context>
chip_gen: v7x
topology: tpu7x:2x2x1
jax: 0.10.0
libtpu: 0.0.40
codegen_flags: <defaults>
</compile_context>

<pallas_src>
import functools

import jax
import jax.numpy as jnp
from jax.experimental import pallas as pl
from jax.experimental.pallas import tpu as pltpu


def dsconv_kernel(x_ref, dw_w_ref, dw_b_ref, pw_w_ref, pw_b_ref, out_ref, *, H, W):
    # Block shapes (TB images per grid step):
    #   x_ref   : (TB, C_in,  H*W)   NCHW input, spatial flattened onto lanes
    #   dw_w_ref: (C_in, 9)          depthwise 3x3 weights, tap t = kh*3 + kw
    #   dw_b_ref: (C_in, 1)          depthwise bias
    #   pw_w_ref: (C_out, C_in)      pointwise 1x1 weights
    #   pw_b_ref: (C_out, 1)         pointwise bias
    #   out_ref : (TB, C_out, H*W)
    TB, C_in, L = x_ref.shape
    C_out = out_ref.shape[1]
    R = TB * C_in

    # Merge (TB, C_in) onto the sublane axis: depthwise conv is per-row independent.
    x = x_ref[...].reshape(R, L)  # (R, L) f32

    # Border masks, hoisted out of the tap loop.  lane index within an image = h*W + w.
    lane = jax.lax.broadcasted_iota(jnp.int32, (1, L), 1)
    col = lane % W
    not_top = lane >= W               # source row h >= 1     (needed when dh == -1)
    not_bottom = lane < (H - 1) * W   # source row h <= H-2   (needed when dh == +1)
    not_left = col >= 1               # source col w >= 1     (needed when dw == -1)
    not_right = col <= W - 2          # source col w <= W-2   (needed when dw == +1)

    # Per-row tap weights / bias (repeat the per-channel values once per image tile).
    dw_w = dw_w_ref[...]              # (C_in, 9)
    dw_b = dw_b_ref[...]              # (C_in, 1)
    if TB > 1:
        dw_w = jnp.tile(dw_w, (TB, 1))   # (R, 9)
        dw_b = jnp.tile(dw_b, (TB, 1))   # (R, 1)

    # Depthwise 3x3, padding=1, groups=C_in: 9 shifted multiply-accumulates on the VPU.
    # shifted[i] = x[i + s] with s = dh*W + dw, realized as a lane roll; taps that would
    # fall outside the image are masked to zero (== zero padding).
    acc = jnp.zeros((R, L), jnp.float32)
    for kh in range(3):
        dh = kh - 1
        for kw in range(3):
            dwk = kw - 1
            s = dh * W + dwk
            t = kh * 3 + kw
            shifted = x if s == 0 else pltpu.roll(x, (-s) % L, axis=1)
            valid = None
            if dh == -1:
                valid = not_top
            elif dh == 1:
                valid = not_bottom
            if dwk == -1:
                valid = not_left if valid is None else valid & not_left
            elif dwk == 1:
                valid = not_right if valid is None else valid & not_right
            tap = shifted if valid is None else jnp.where(valid, shifted, 0.0)
            acc = acc + tap * dw_w[:, t:t + 1]

    dwout = (acc + dw_b).reshape(TB, C_in, L)   # leading-dim split, layout-free

    # Pointwise 1x1 conv: C_in -> C_out.
    pw_w = pw_w_ref[...]                        # (C_out, C_in)
    if C_in <= 32:
        # Tiny contraction: keep it on the VPU (MXU would be pure push/pop latency).
        fea = jnp.zeros((TB, C_out, L), jnp.float32)
        for ci in range(C_in):
            fea = fea + pw_w[:, ci:ci + 1][None] * dwout[:, ci:ci + 1, :]
    else:
        # Real channel counts: lane-dense MXU matmul per image.
        fea = jnp.einsum('oc,bcl->bol', pw_w, dwout,
                         preferred_element_type=jnp.float32)

    out_ref[...] = (fea + pw_b_ref[...][None]).astype(out_ref.dtype)


def _pick_batch_tile(N, C_in, C_out, L, budget_bytes=8 << 20, max_tile=8):
    """Largest divisor of N whose per-step footprint stays under the VMEM budget."""
    # input + depthwise intermediate + output, x2 for double-buffering headroom.
    per_img = (2 * C_in + C_out) * L * 4 * 2
    cap = max(1, min(max_tile, budget_bytes // max(per_img, 1)))
    tb = 1
    for cand in range(1, N + 1):
        if N % cand == 0 and cand <= cap:
            tb = cand
    return tb


def dsconv_forward(x_nchw, params, *, batch_tile=None):
    """PyTorch-semantics depthwise_separable_conv forward. Input/output are NCHW f32."""
    dw_w, dw_b, pw_w, pw_b = params
    N, C_in, H, W = x_nchw.shape
    C_out = pw_w.shape[0]
    L = H * W

    if batch_tile is None:
        batch_tile = _pick_batch_tile(N, C_in, C_out, L)
    assert N % batch_tile == 0
    grid = (N // batch_tile,)

    x_flat = x_nchw.reshape(N, C_in, L).astype(jnp.float32)   # free reshape, no transpose

    out_flat = pl.pallas_call(
        functools.partial(dsconv_kernel, H=H, W=W),
        out_shape=jax.ShapeDtypeStruct((N, C_out, L), jnp.float32),
        grid=grid,
        in_specs=[
            pl.BlockSpec((batch_tile, C_in, L), lambda b: (b, 0, 0)),
            pl.BlockSpec((C_in, 9), lambda b: (0, 0)),
            pl.BlockSpec((C_in, 1), lambda b: (0, 0)),
            pl.BlockSpec((C_out, C_in), lambda b: (0, 0)),
            pl.BlockSpec((C_out, 1), lambda b: (0, 0)),
        ],
        out_specs=pl.BlockSpec((batch_tile, C_out, L), lambda b: (b, 0, 0)),
        compiler_params=pltpu.CompilerParams(
            dimension_semantics=("parallel",),
            vmem_limit_bytes=48 * 1024 * 1024,
        ),
    )(x_flat,
      dw_w.reshape(C_in, 9).astype(jnp.float32),
      dw_b.reshape(C_in, 1).astype(jnp.float32),
      pw_w.astype(jnp.float32),
      pw_b.reshape(C_out, 1).astype(jnp.float32))

    return out_flat.reshape(N, C_out, H, W)   # free reshape back to NCHW


def init_params(key, ch_in, ch_out):
    """Deterministic synthetic parameters matching the PyTorch module shapes.

    PyTorch shapes:
      depth_conv.weight (C_in, 1, 3, 3), bias (C_in,)     [groups = C_in]
      point_conv.weight (C_out, C_in, 1, 1), bias (C_out,)
    Stored here with the singleton dims dropped.
    """
    ks = jax.random.split(key, 4)
    dw_w = 0.1 * jax.random.normal(ks[0], (ch_in, 3, 3), jnp.float32)
    dw_b = 0.1 * jax.random.normal(ks[1], (ch_in,), jnp.float32)
    pw_w = 0.1 * jax.random.normal(ks[2], (ch_out, ch_in), jnp.float32)
    pw_b = 0.1 * jax.random.normal(ks[3], (ch_out,), jnp.float32)
    return dw_w, dw_b, pw_w, pw_b


def dsconv_reference(x_nchw, params):
    """Pure-JAX reference with identical math (for correctness check)."""
    dw_w, dw_b, pw_w, pw_b = params
    N, C, H, W = x_nchw.shape
    xp = jnp.pad(x_nchw, ((0, 0), (0, 0), (1, 1), (1, 1)))
    acc = jnp.zeros_like(x_nchw)
    for kh in range(3):
        for kw in range(3):
            acc = acc + xp[:, :, kh:kh + H, kw:kw + W] * dw_w[:, kh, kw][None, :, None, None]
    acc = acc + dw_b[None, :, None, None]
    out = jnp.einsum('oc,nchw->nohw', pw_w, acc,
                     precision=jax.lax.Precision.HIGHEST) + pw_b[None, :, None, None]
    return out


if __name__ == "__main__":
    N, ch_in, ch_out, H, W = 2, 4, 8, 16, 16

    key = jax.random.PRNGKey(0)
    kx, kp = jax.random.split(key)
    x = jax.random.normal(kx, (N, ch_in, H, W), jnp.float32)   # NCHW, like PyTorch
    params = init_params(kp, ch_in, ch_out)

    out = dsconv_forward(x, params)
    out = jax.block_until_ready(out)

    ref = dsconv_reference(x, params)
    assert out.shape == (N, ch_out, H, W)
    assert jnp.allclose(out, ref, atol=1e-4, rtol=1e-4), "mismatch vs pure-JAX reference"

    print("KERNEL_OK")
</pallas_src>

<mosaic_0001>
module attributes {stable_mosaic.version = 11 : i64} {
  func.func @dsconv_kernel(%arg0: i32, %arg1: memref<2x4x256xf32, #tpu.memory_space<vmem>>, %arg2: memref<4x9xf32, #tpu.memory_space<vmem>>, %arg3: memref<4x1xf32, #tpu.memory_space<vmem>>, %arg4: memref<8x4xf32, #tpu.memory_space<vmem>>, %arg5: memref<8x1xf32, #tpu.memory_space<vmem>>, %arg6: memref<2x8x256xf32, #tpu.memory_space<vmem>>) attributes {dimension_semantics = [#tpu.dimension_semantics<parallel>], iteration_bounds = array<i64: 1>, scalar_prefetch = 0 : i64, scratch_operands = 0 : i64, tpu.core_type = #tpu.core_type<tc>, window_params = [{transform_indices = @transform_0, window_bounds = array<i64: 2, 4, 256>}, {pipeline_mode = #tpu.pipeline_mode<synchronous>, transform_indices = @transform_1, window_bounds = array<i64: 4, 9>}, {pipeline_mode = #tpu.pipeline_mode<synchronous>, transform_indices = @transform_2, window_bounds = array<i64: 4, 1>}, {pipeline_mode = #tpu.pipeline_mode<synchronous>, transform_indices = @transform_3, window_bounds = array<i64: 8, 4>}, {pipeline_mode = #tpu.pipeline_mode<synchronous>, transform_indices = @transform_4, window_bounds = array<i64: 8, 1>}, {transform_indices = @transform_5, window_bounds = array<i64: 2, 8, 256>}]} {
    %c0 = arith.constant 0 : index
    %c0_0 = arith.constant 0 : index
    %c0_1 = arith.constant 0 : index
    %0 = vector.load %arg1[%c0, %c0_0, %c0_1] : memref<2x4x256xf32, #tpu.memory_space<vmem>>, vector<2x4x256xf32>
    %1 = vector.shape_cast %0 : vector<2x4x256xf32> to vector<8x256xf32>
    %2 = tpu.iota {dimensions = array<i32: 1>} : vector<1x256xi32>
    %c16_i32 = arith.constant 16 : i32
    %c0_i32 = arith.constant 0 : i32
    %3 = arith.cmpi eq, %c16_i32, %c0_i32 : i32
    %c1_i32 = arith.constant 1 : i32
    %4 = arith.select %3, %c1_i32, %c16_i32 : i32
    %5 = vector.broadcast %4 : i32 to vector<1x256xi32>
    %6 = arith.remsi %2, %5 : vector<1x256xi32>
    %c0_i32_2 = arith.constant 0 : i32
    %7 = vector.broadcast %c0_i32_2 : i32 to vector<1x256xi32>
    %8 = arith.cmpi ne, %6, %7 : vector<1x256xi32>
    %c0_i32_3 = arith.constant 0 : i32
    %9 = vector.broadcast %c0_i32_3 : i32 to vector<1x256xi32>
    %10 = arith.cmpi slt, %6, %9 : vector<1x256xi32>
    %c0_i32_4 = arith.constant 0 : i32
    %11 = arith.cmpi slt, %4, %c0_i32_4 : i32
    %12 = vector.broadcast %11 : i1 to vector<1x256xi1>
    %13 = vector.broadcast %12 : vector<1x256xi1> to vector<1x256xi1>
    %14 = arith.xori %10, %13 : vector<1x256xi1>
    %15 = arith.andi %14, %8 : vector<1x256xi1>
    %16 = vector.broadcast %4 : i32 to vector<1x256xi32>
    %17 = arith.addi %6, %16 : vector<1x256xi32>
    %18 = arith.select %15, %17, %6 : vector<1x256xi1>, vector<1x256xi32>
    %c16_i32_5 = arith.constant 16 : i32
    %19 = vector.broadcast %c16_i32_5 : i32 to vector<1x256xi32>
    %20 = arith.cmpi sge, %2, %19 : vector<1x256xi32>
    %c240_i32 = arith.constant 240 : i32
    %21 = vector.broadcast %c240_i32 : i32 to vector<1x256xi32>
    %22 = arith.cmpi slt, %2, %21 : vector<1x256xi32>
    %c1_i32_6 = arith.constant 1 : i32
    %23 = vector.broadcast %c1_i32_6 : i32 to vector<1x256xi32>
    %24 = arith.cmpi sge, %18, %23 : vector<1x256xi32>
    %c14_i32 = arith.constant 14 : i32
    %25 = vector.broadcast %c14_i32 : i32 to vector<1x256xi32>
    %26 = arith.cmpi sle, %18, %25 : vector<1x256xi32>
    %c0_7 = arith.constant 0 : index
    %c0_8 = arith.constant 0 : index
    %27 = vector.load %arg2[%c0_7, %c0_8] : memref<4x9xf32, #tpu.memory_space<vmem>>, vector<4x9xf32>
    %c0_9 = arith.constant 0 : index
    %c0_10 = arith.constant 0 : index
    %28 = vector.load %arg3[%c0_9, %c0_10] : memref<4x1xf32, #tpu.memory_space<vmem>>, vector<4x1xf32>
    %29 = tpu.concatenate %27, %27 in 0 : vector<4x9xf32>, vector<4x9xf32> -> vector<8x9xf32>
    %30 = tpu.concatenate %28, %28 in 0 : vector<4x1xf32>, vector<4x1xf32> -> vector<8x1xf32>
    %cst = arith.constant 0.000000e+00 : f32
    %31 = vector.broadcast %cst : f32 to vector<8x256xf32>
    %c17_i32 = arith.constant 17 : i32
    %32 = tpu.dynamic_rotate %1 by %c17_i32 dim 1 : vector<8x256xf32>, i32 -> vector<8x256xf32>
    %33 = arith.andi %20, %24 : vector<1x256xi1>
    %cst_11 = arith.constant 0.000000e+00 : f32
    %34 = vector.shape_cast %33 : vector<1x256xi1> to vector<1x256xi1>
    %35 = vector.broadcast %34 : vector<1x256xi1> to vector<8x256xi1>
    %36 = vector.broadcast %cst_11 : f32 to vector<8x256xf32>
    %37 = arith.select %35, %32, %36 : vector<8x256xi1>, vector<8x256xf32>
    %38 = vector.extract_strided_slice %29 {offsets = [0, 0], sizes = [8, 1], strides = [1, 1]} : vector<8x9xf32> to vector<8x1xf32>
    %39 = vector.broadcast %38 : vector<8x1xf32> to vector<8x256xf32>
    %40 = arith.mulf %37, %39 : vector<8x256xf32>
    %41 = arith.addf %31, %40 : vector<8x256xf32>
    %c16_i32_12 = arith.constant 16 : i32
    %42 = tpu.dynamic_rotate %1 by %c16_i32_12 dim 1 : vector<8x256xf32>, i32 -> vector<8x256xf32>
    %cst_13 = arith.constant 0.000000e+00 : f32
    %43 = vector.shape_cast %20 : vector<1x256xi1> to vector<1x256xi1>
    %44 = vector.broadcast %43 : vector<1x256xi1> to vector<8x256xi1>
    %45 = vector.broadcast %cst_13 : f32 to vector<8x256xf32>
    %46 = arith.select %44, %42, %45 : vector<8x256xi1>, vector<8x256xf32>
    %47 = vector.extract_strided_slice %29 {offsets = [0, 1], sizes = [8, 1], strides = [1, 1]} : vector<8x9xf32> to vector<8x1xf32>
    %48 = vector.broadcast %47 : vector<8x1xf32> to vector<8x256xf32>
    %49 = arith.mulf %46, %48 : vector<8x256xf32>
    %50 = arith.addf %41, %49 : vector<8x256xf32>
    %c15_i32 = arith.constant 15 : i32
    %51 = tpu.dynamic_rotate %1 by %c15_i32 dim 1 : vector<8x256xf32>, i32 -> vector<8x256xf32>
    %52 = arith.andi %20, %26 : vector<1x256xi1>
    %cst_14 = arith.constant 0.000000e+00 : f32
    %53 = vector.shape_cast %52 : vector<1x256xi1> to vector<1x256xi1>
    %54 = vector.broadcast %53 : vector<1x256xi1> to vector<8x256xi1>
    %55 = vector.broadcast %cst_14 : f32 to vector<8x256xf32>
    %56 = arith.select %54, %51, %55 : vector<8x256xi1>, vector<8x256xf32>
    %57 = vector.extract_strided_slice %29 {offsets = [0, 2], sizes = [8, 1], strides = [1, 1]} : vector<8x9xf32> to vector<8x1xf32>
    %58 = vector.broadcast %57 : vector<8x1xf32> to vector<8x256xf32>
    %59 = arith.mulf %56, %58 : vector<8x256xf32>
    %60 = arith.addf %50, %59 : vector<8x256xf32>
    %c1_i32_15 = arith.constant 1 : i32
    %61 = tpu.dynamic_rotate %1 by %c1_i32_15 dim 1 : vector<8x256xf32>, i32 -> vector<8x256xf32>
    %cst_16 = arith.constant 0.000000e+00 : f32
    %62 = vector.shape_cast %24 : vector<1x256xi1> to vector<1x256xi1>
    %63 = vector.broadcast %62 : vector<1x256xi1> to vector<8x256xi1>
    %64 = vector.broadcast %cst_16 : f32 to vector<8x256xf32>
    %65 = arith.select %63, %61, %64 : vector<8x256xi1>, vector<8x256xf32>
    %66 = vector.extract_strided_slice %29 {offsets = [0, 3], sizes = [8, 1], strides = [1, 1]} : vector<8x9xf32> to vector<8x1xf32>
    %67 = vector.broadcast %66 : vector<8x1xf32> to vector<8x256xf32>
    %68 = arith.mulf %65, %67 : vector<8x256xf32>
    %69 = arith.addf %60, %68 : vector<8x256xf32>
    %70 = vector.extract_strided_slice %29 {offsets = [0, 4], sizes = [8, 1], strides = [1, 1]} : vector<8x9xf32> to vector<8x1xf32>
    %71 = vector.broadcast %70 : vector<8x1xf32> to vector<8x256xf32>
    %72 = arith.mulf %1, %71 : vector<8x256xf32>
    %73 = arith.addf %69, %72 : vector<8x256xf32>
    %c255_i32 = arith.constant 255 : i32
    %74 = tpu.dynamic_rotate %1 by %c255_i32 dim 1 : vector<8x256xf32>, i32 -> vector<8x256xf32>
    %cst_17 = arith.constant 0.000000e+00 : f32
    %75 = vector.shape_cast %26 : vector<1x256xi1> to vector<1x256xi1>
    %76 = vector.broadcast %75 : vector<1x256xi1> to vector<8x256xi1>
    %77 = vector.broadcast %cst_17 : f32 to vector<8x256xf32>
    %78 = arith.select %76, %74, %77 : vector<8x256xi1>, vector<8x256xf32>
    %79 = vector.extract_strided_slice %29 {offsets = [0, 5], sizes = [8, 1], strides = [1, 1]} : vector<8x9xf32> to vector<8x1xf32>
    %80 = vector.broadcast %79 : vector<8x1xf32> to vector<8x256xf32>
    %81 = arith.mulf %78, %80 : vector<8x256xf32>
    %82 = arith.addf %73, %81 : vector<8x256xf32>
    %c241_i32 = arith.constant 241 : i32
    %83 = tpu.dynamic_rotate %1 by %c241_i32 dim 1 : vector<8x256xf32>, i32 -> vector<8x256xf32>
    %84 = arith.andi %22, %24 : vector<1x256xi1>
    %cst_18 = arith.constant 0.000000e+00 : f32
    %85 = vector.shape_cast %84 : vector<1x256xi1> to vector<1x256xi1>
    %86 = vector.broadcast %85 : vector<1x256xi1> to vector<8x256xi1>
    %87 = vector.broadcast %cst_18 : f32 to vector<8x256xf32>
    %88 = arith.select %86, %83, %87 : vector<8x256xi1>, vector<8x256xf32>
    %89 = vector.extract_strided_slice %29 {offsets = [0, 6], sizes = [8, 1], strides = [1, 1]} : vector<8x9xf32> to vector<8x1xf32>
    %90 = vector.broadcast %89 : vector<8x1xf32> to vector<8x256xf32>
    %91 = arith.mulf %88, %90 : vector<8x256xf32>
    %92 = arith.addf %82, %91 : vector<8x256xf32>
    %c240_i32_19 = arith.constant 240 : i32
    %93 = tpu.dynamic_rotate %1 by %c240_i32_19 dim 1 : vector<8x256xf32>, i32 -> vector<8x256xf32>
    %cst_20 = arith.constant 0.000000e+00 : f32
    %94 = vector.shape_cast %22 : vector<1x256xi1> to vector<1x256xi1>
    %95 = vector.broadcast %94 : vector<1x256xi1> to vector<8x256xi1>
    %96 = vector.broadcast %cst_20 : f32 to vector<8x256xf32>
    %97 = arith.select %95, %93, %96 : vector<8x256xi1>, vector<8x256xf32>
    %98 = vector.extract_strided_slice %29 {offsets = [0, 7], sizes = [8, 1], strides = [1, 1]} : vector<8x9xf32> to vector<8x1xf32>
    %99 = vector.broadcast %98 : vector<8x1xf32> to vector<8x256xf32>
    %100 = arith.mulf %97, %99 : vector<8x256xf32>
    %101 = arith.addf %92, %100 : vector<8x256xf32>
    %c239_i32 = arith.constant 239 : i32
    %102 = tpu.dynamic_rotate %1 by %c239_i32 dim 1 : vector<8x256xf32>, i32 -> vector<8x256xf32>
    %103 = arith.andi %22, %26 : vector<1x256xi1>
    %cst_21 = arith.constant 0.000000e+00 : f32
    %104 = vector.shape_cast %103 : vector<1x256xi1> to vector<1x256xi1>
    %105 = vector.broadcast %104 : vector<1x256xi1> to vector<8x256xi1>
    %106 = vector.broadcast %cst_21 : f32 to vector<8x256xf32>
    %107 = arith.select %105, %102, %106 : vector<8x256xi1>, vector<8x256xf32>
    %108 = vector.extract_strided_slice %29 {offsets = [0, 8], sizes = [8, 1], strides = [1, 1]} : vector<8x9xf32> to vector<8x1xf32>
    %109 = vector.broadcast %108 : vector<8x1xf32> to vector<8x256xf32>
    %110 = arith.mulf %107, %109 : vector<8x256xf32>
    %111 = arith.addf %101, %110 : vector<8x256xf32>
    %112 = vector.broadcast %30 : vector<8x1xf32> to vector<8x256xf32>
    %113 = arith.addf %111, %112 : vector<8x256xf32>
    %114 = vector.shape_cast %113 : vector<8x256xf32> to vector<2x4x256xf32>
    %c0_22 = arith.constant 0 : index
    %c0_23 = arith.constant 0 : index
    %115 = vector.load %arg4[%c0_22, %c0_23] : memref<8x4xf32, #tpu.memory_space<vmem>>, vector<8x4xf32>
    %cst_24 = arith.constant 0.000000e+00 : f32
    %116 = vector.broadcast %cst_24 : f32 to vector<2x8x256xf32>
    %117 = vector.extract_strided_slice %115 {offsets = [0, 0], sizes = [8, 1], strides = [1, 1]} : vector<8x4xf32> to vector<8x1xf32>
    %118 = vector.shape_cast %117 : vector<8x1xf32> to vector<1x8x1xf32>
    %119 = vector.extract_strided_slice %114 {offsets = [0, 0, 0], sizes = [2, 1, 256], strides = [1, 1, 1]} : vector<2x4x256xf32> to vector<2x1x256xf32>
    %120 = vector.broadcast %118 : vector<1x8x1xf32> to vector<2x8x256xf32>
    %121 = vector.broadcast %119 : vector<2x1x256xf32> to vector<2x8x256xf32>
    %122 = arith.mulf %120, %121 : vector<2x8x256xf32>
    %123 = arith.addf %116, %122 : vector<2x8x256xf32>
    %124 = vector.extract_strided_slice %115 {offsets = [0, 1], sizes = [8, 1], strides = [1, 1]} : vector<8x4xf32> to vector<8x1xf32>
    %125 = vector.shape_cast %124 : vector<8x1xf32> to vector<1x8x1xf32>
    %126 = vector.extract_strided_slice %114 {offsets = [0, 1, 0], sizes = [2, 1, 256], strides = [1, 1, 1]} : vector<2x4x256xf32> to vector<2x1x256xf32>
    %127 = vector.broadcast %125 : vector<1x8x1xf32> to vector<2x8x256xf32>
    %128 = vector.broadcast %126 : vector<2x1x256xf32> to vector<2x8x256xf32>
    %129 = arith.mulf %127, %128 : vector<2x8x256xf32>
    %130 = arith.addf %123, %129 : vector<2x8x256xf32>
    %131 = vector.extract_strided_slice %115 {offsets = [0, 2], sizes = [8, 1], strides = [1, 1]} : vector<8x4xf32> to vector<8x1xf32>
    %132 = vector.shape_cast %131 : vector<8x1xf32> to vector<1x8x1xf32>
    %133 = vector.extract_strided_slice %114 {offsets = [0, 2, 0], sizes = [2, 1, 256], strides = [1, 1, 1]} : vector<2x4x256xf32> to vector<2x1x256xf32>
    %134 = vector.broadcast %132 : vector<1x8x1xf32> to vector<2x8x256xf32>
    %135 = vector.broadcast %133 : vector<2x1x256xf32> to vector<2x8x256xf32>
    %136 = arith.mulf %134, %135 : vector<2x8x256xf32>
    %137 = arith.addf %130, %136 : vector<2x8x256xf32>
    %138 = vector.extract_strided_slice %115 {offsets = [0, 3], sizes = [8, 1], strides = [1, 1]} : vector<8x4xf32> to vector<8x1xf32>
    %139 = vector.shape_cast %138 : vector<8x1xf32> to vector<1x8x1xf32>
    %140 = vector.extract_strided_slice %114 {offsets = [0, 3, 0], sizes = [2, 1, 256], strides = [1, 1, 1]} : vector<2x4x256xf32> to vector<2x1x256xf32>
    %141 = vector.broadcast %139 : vector<1x8x1xf32> to vector<2x8x256xf32>
    %142 = vector.broadcast %140 : vector<2x1x256xf32> to vector<2x8x256xf32>
    %143 = arith.mulf %141, %142 : vector<2x8x256xf32>
    %144 = arith.addf %137, %143 : vector<2x8x256xf32>
    %c0_25 = arith.constant 0 : index
    %c0_26 = arith.constant 0 : index
    %145 = vector.load %arg5[%c0_25, %c0_26] : memref<8x1xf32, #tpu.memory_space<vmem>>, vector<8x1xf32>
    %146 = vector.shape_cast %145 : vector<8x1xf32> to vector<1x8x1xf32>
    %147 = vector.broadcast %146 : vector<1x8x1xf32> to vector<2x8x256xf32>
    %148 = arith.addf %144, %147 : vector<2x8x256xf32>
    %c0_27 = arith.constant 0 : index
    %c0_28 = arith.constant 0 : index
    %c0_29 = arith.constant 0 : index
    %149 = vector.load %arg6[%c0_27, %c0_28, %c0_29] : memref<2x8x256xf32, #tpu.memory_space<vmem>>, vector<2x8x256xf32>
    tpu.vector_store %arg6[%c0_27, %c0_28, %c0_29], %148 {strides = array<i32>} : memref<2x8x256xf32, #tpu.memory_space<vmem>>, vector<2x8x256xf32>,
    return
  }
  func.func @transform_0(%arg0: i32) -> (i32, i32, i32) {
    %c0_i32 = arith.constant 0 : i32
    %c0_i32_0 = arith.constant 0 : i32
    %c0_i32_1 = arith.constant 0 : i32
    return %arg0, %c0_i32, %c0_i32_0 : i32, i32, i32
  }
  func.func @transform_1(%arg0: i32) -> (i32, i32) {
    %c0_i32 = arith.constant 0 : i32
    %c0_i32_0 = arith.constant 0 : i32
    %c0_i32_1 = arith.constant 0 : i32
    return %c0_i32, %c0_i32_0 : i32, i32
  }
  func.func @transform_2(%arg0: i32) -> (i32, i32) {
    %c0_i32 = arith.constant 0 : i32
    %c0_i32_0 = arith.constant 0 : i32
    %c0_i32_1 = arith.constant 0 : i32
    return %c0_i32, %c0_i32_0 : i32, i32
  }
  func.func @transform_3(%arg0: i32) -> (i32, i32) {
    %c0_i32 = arith.constant 0 : i32
    %c0_i32_0 = arith.constant 0 : i32
    %c0_i32_1 = arith.constant 0 : i32
    return %c0_i32, %c0_i32_0 : i32, i32
  }
  func.func @transform_4(%arg0: i32) -> (i32, i32) {
    %c0_i32 = arith.constant 0 : i32
    %c0_i32_0 = arith.constant 0 : i32
    %c0_i32_1 = arith.constant 0 : i32
    return %c0_i32, %c0_i32_0 : i32, i32
  }
  func.func @transform_5(%arg0: i32) -> (i32, i32, i32) {
    %c0_i32 = arith.constant 0 : i32
    %c0_i32_0 = arith.constant 0 : i32
    %c0_i32_1 = arith.constant 0 : i32
    return %arg0, %c0_i32, %c0_i32_0 : i32, i32, i32
  }
}

</mosaic_0001>

<bundles_post_ra>
// kernel: tpu_custom_call.1
= control target key start
LH: loop header
LB: loop body
LE: loop exit
PB: predicated region body
PF: predicated region fallthrough
CT: control target
= control target key end

     0   :  { %vm63_vm0 = vcmask 1043456   ;;  %v577_v1 = vmov 2   ;;  %v578_v2 = vmov 1   ;;  %s826_s0 = inlined_call_operand.vmem [shape: f32[2,4,256], index: 0, kind: input, shape index: {}]   ;;  %s827_s1 = inlined_call_operand.vmem [shape: f32[4,9], index: 1, kind: input, shape index: {}]   ;;  %s828_s2 = inlined_call_operand.vmem [shape: f32[4,1], index: 2, kind: input, shape index: {}]   ;;  %s829_s3 = inlined_call_operand.vmem [shape: f32[8,4], index: 3, kind: input, shape index: {}]   ;;  %s830_s4 = inlined_call_operand.vmem [shape: f32[8,1], index: 4, kind: input, shape index: {}]   ;;  %s831_s5 = inlined_call_operand.hbm [shape: f32[2,8,256], index: 5, kind: output, shape index: {}]  }
   0x1   :  { %v58_v0 = vld [vmem:[%s827_s1] sm:$0xf]  ;;  %538 = vset.pattern.permute.xlu1 %v577_v1  ;;  %537 = vset.pattern.permute.xlu0 %v578_v2  ;;  %v639_v5 = vld [vmem:[%s826_s0 + $0x8] sm:$0xff] }
   0x2   :  { %v61_v3 = vrot.slane %v58_v0, 4  ;;  %v634_v4 = vld [vmem:[%s826_s0] sm:$0xff] }
   0x3   :  { %v71_v7 = vcombine.low %v634_v4, %v639_v5 }
   0x4   :  { %v64_v6 = vsel %vm63_vm0, %v58_v0, %v61_v3 }
   0x5   :  { %136 = vperm.xlu1 %538, %v64_v6   ;;  %113 = vperm.xlu0 %537, %v64_v6  }
   0x6   :  { %10 = vsyncpa [#allocation3], 0  ;;  %v579_v8 = vmov 4   ;;  %s580_s1 = smov 17   ;;  %v581_v9 = vmov 5   ;;  %s582_s24 = smov 16   ;;  %v72_v11 = vcombine.high %v634_v4, %v639_v5  ;;  %v23_v31 = vlaneseq }
   0x7   :  { %v583_v10 = vmov 3   ;;  %s584_s0 = smov 15   ;;  %v585_v12 = vmov 7   ;;  %v586_v13 = vmov 6   ;;  %v587_v14 = vmov 0   ;;  %s588_s25 = smov 1  }
   0x8   :  { %s589_s26 = smov 127   ;;  %v59_v15 = vld [vmem:[%s828_s2] sm:$0xf]  ;;  %s590_s29 = smov 113   ;;  %v592_v17 = vmov 8   ;;  %v666_v33 = vand.u32 127, %v23_v31 }
   0x9   :  { %539 = vset.pattern.permute.xlu1 %v579_v8  ;;  %75 = vrot.lane.b32.xlu0 %v71_v7, %s580_s1  ;;  %v66_v16 = vrot.slane %v59_v15, 4  ;;  %s591_s30 = smov 112   ;;  %v292_v19 = vld [vmem:[%s829_s3] sm:$0xff]  ;;  %s593_s2 = smov 111   ;;  %v594_v38 = vmov 839922192  }
   0xa   :  { %165 = vperm.xlu1 %539, %v64_v6   ;;  %541 = vset.pattern.permute.xlu0 %v581_v9  ;;  %v486_v20 = vld [vmem:[%s830_s4] sm:$0xff]  ;;  %v30_v36 = vand.u32 15, %v666_v33  ;;  %v672_v37 = vadd.s32 128, %v666_v33  ;;  %v168_v39 = vunpack.c.l.s4 %v594_v38  ;;  %v595_v40 = vmov 1985246804   ;;  %s596_s3 = smov [#allocation2]  }
   0xb   :  { %v68_v18 = vsel %vm63_vm0, %v59_v15, %v66_v16  ;;  %v175_v41 = vunpack.c.l.s4 %v595_v40  ;;  %vm79_vm1 = vcmp.lt.s32.totalorder %v666_v33, 17  ;;  %vm50_vm2 = vcmp.ge.s32.totalorder %v666_v33, 16  ;;  %s505_s4 = sshll.u32 %s596_s3, 4  ;;  %s506_s4 = int_to_ptr.vmem [resolvable:$true] %s505_s4 }
   0xc   :  { %vm103_vm3 = vcmp.lt.s32.totalorder %v666_v33, 16  ;;  %vm677_vm4 = vcmp.ge.s32.totalorder %v30_v36, 1  ;;  %v37_v45 = vand.u32 15, %v672_v37  ;;  %v169_v46 = vunpack.c.0.s8 %v168_v39  ;;  %s553_s10 = scalar_lea.vmem %s506_s4, 512  ;;  %p558_p1 = scmp.lt.s32.totalorder %s506_s4, %s506_s4 }
   0xd   :  { %99 = vrot.lane.b32.xlu0 %v71_v7, %s582_s24  ;;  %v176_v47 = vunpack.c.0.s8 %v175_v41  ;;  %v682_v48 = vshrl.u32 %v23_v31, 7  ;;  %vm82_vm5 = vmand %vm50_vm2, %vm677_vm4  ;;  %vm694_vm6 = vcmp.le.s32.totalorder %v30_v36, 14  ;;  %vm124_vm7 = vcmp.lt.s32.totalorder %v666_v33, 15  ;;  %p554_p0 = scmp.ne.s32.totalorder %s506_s4, %s553_s10  ;;  %p559_p2 = scmp.lt.s32.totalorder %s553_s10, %s553_s10 }
   0xe   :  { %540 = vset.pattern.permute.xlu1 %v583_v10  ;;  %vm147_vm8 = vcmp.lt.s32.totalorder %v666_v33, 1  ;;  %vm702_vm9 = vcmp.ge.s32.totalorder %v37_v45, 1  ;;  %vm714_vm10 = vmand %vm50_vm2, %vm694_vm6  ;;  %vm724_vm11 = vcmp.le.s32.totalorder %v37_v45, 14  ;;  %vm197_vm12 = vcmp.lt.s32.totalorder %v666_v33, 127 }
   0xf   :  { %157 = vperm.xlu1 %540, %v64_v6   ;;  %v172_v55 = vsub.s32 %v169_v46, %v682_v48  ;;  %v179_v56 = vsub.s32 %v176_v47, %v682_v48  ;;  %vm218_vm13 = vcmp.lt.s32.totalorder %v666_v33, 113  ;;  %vm53_vm14 = vcmp.lt.s32.totalorder %v672_v37, 240  ;;  %p560_p3 = por %p559_p2, %p558_p1 }
  0x10   :  { %vm241_vm15 = vcmp.lt.s32.totalorder %v666_v33, 112  ;;  %vm766_vm0 = vmand %vm53_vm14, %vm702_vm9  ;;  %v348_v37 = vsub.s32 1, %v682_v48  ;;  %v448_v52 = vsub.s32 7, %v682_v48 }
  0x11   :  { %120 = vrot.lane.b32.xlu0 %v71_v7, %s584_s0  ;;  %p561_p4 = pnand %p560_p3, %p554_p0 }
  0x13   :  { %77 = vrot.lane.b32.xlu1 %v72_v11, %s580_s1 }
  0x14   :  { %544 = vset.pattern.permute.xlu1 %v585_v12 }
  0x15   :  { %207 = vperm.xlu0 %541, %v64_v6  }
  0x17   :  { %101 = vrot.lane.b32.xlu1 %v72_v11, %s582_s24 }
  0x19   :  { %542 = vset.pattern.permute.xlu0 %v586_v13 }
  0x1a   :  { %230 = vperm.xlu0 %542, %v64_v6  }
  0x1b   :  { %122 = vrot.lane.b32.xlu1 %v72_v11, %s584_s0 }
  0x1e   :  { %543 = vset.pattern.permute.xlu0 %v587_v14 }
  0x1f   :  { %143 = vrot.lane.b32.xlu1 %v71_v7, %s588_s25  ;;  %92 = vperm.xlu0 %543, %v64_v6  }
  0x23   :  { %145 = vrot.lane.b32.xlu1 %v72_v11, %s588_s25  ;;  %195 = vrot.lane.b32.xlu0 %v72_v11, %s589_s26 }
  0x27   :  { %251 = vperm.xlu1 %544, %v64_v6   ;;  %214 = vrot.lane.b32.xlu0 %v71_v7, %s590_s29 }
  0x2b   :  { %193 = vrot.lane.b32.xlu1 %v71_v7, %s589_s26  ;;  %237 = vrot.lane.b32.xlu0 %v71_v7, %s591_s30 }
  0x2c   :  { %545 = vset.pattern.permute.xlu1 %v592_v17 }
  0x2f   :  { %274 = vperm.xlu1 %545, %v64_v6   ;;  %283 = vperm.xlu0 %543, %v68_v18  }
  0x33   :  { %295 = vperm.xlu0 %543, %v292_v19   ;;  %216 = vrot.lane.b32.xlu1 %v72_v11, %s590_s29 }
  0x34   :  { %546 = vset.pattern.permute.xlu1 %v578_v2 }
  0x37   :  { %239 = vrot.lane.b32.xlu1 %v72_v11, %s591_s30  ;;  %547 = vset.pattern.permute.xlu0 %v577_v1 }
  0x38   :  { %391 = vperm.xlu0 %547, %v292_v19  }
  0x3b   :  { %258 = vrot.lane.b32.xlu1 %v71_v7, %s593_s2 }
  0x3c   :  { %550 = vset.pattern.permute.xlu0 %v587_v14 }
  0x3f   :  { %260 = vrot.lane.b32.xlu1 %v72_v11, %s593_s2 }
  0x43   :  { %343 = vperm.xlu1 %546, %v292_v19  }
  0x47   :  { %548 = vset.pattern.permute.xlu1 %v583_v10 }
  0x48   :  { %439 = vperm.xlu1 %548, %v292_v19  }
  0x4c   :  { %549 = vset.pattern.permute.xlu1 %v587_v14 }
  0x4d   :  { %489 = vperm.xlu1 %549, %v486_v20  }
  0x84   :  { %v658_v21 = vpop.permute.xlu1 %136  ;;  %v114_v22 = vpop.permute.xlu0 %113 }
  0x88   :  { %v76_v23 = vpop.permute.xlu0 %75 }
  0x89   :  { %v660_v24 = vpop.permute.xlu1 %165 }
  0x8a   :  { %v173_v10 = vrot.slane %v660_v24, %v172_v55  ;;  %v180_v11 = vrot.slane %v660_v24, %v179_v56 }
  0x8c   :  { %v100_v25 = vpop.permute.xlu0 %99 }
  0x8e   :  { %v662_v26 = vpop.permute.xlu1 %157 }
  0x90   :  { %v121_v28 = vpop.permute.xlu0 %120 }
  0x92   :  { %v78_v27 = vpop.permute.xlu1 %77 }
  0x93   :  { %v81_v50 = vsel %vm79_vm1, %v78_v27, %v76_v23  ;;  %v80_v53 = vsel %vm79_vm1, %v76_v23, %v78_v27  ;;  %v184_v27 = vmul.f32 %v180_v11, %v639_v5  ;;  %vm262_vm1 = vcmp.lt.s32.totalorder %v666_v33, 111 }
  0x94   :  { %v664_v30 = vpop.permute.xlu0 %207  ;;  %v88_v58 = vsel %vm82_vm5, %v81_v50, 0.0  ;;  %v89_v6 = vsel %vm702_vm9, %v80_v53, 0.0 }
  0x96   :  { %v102_v29 = vpop.permute.xlu1 %101 }
  0x97   :  { %v105_v51 = vsel %vm103_vm3, %v102_v29, %v100_v25  ;;  %v104_v1 = vsel %vm103_vm3, %v100_v25, %v102_v29 }
  0x98   :  { %v110_v57 = vsel %vm50_vm2, %v105_v51, 0.0  ;;  %v117_v15 = vmul.f32 %v114_v22, %v104_v1  ;;  %vm266_vm2 = vmand %vm53_vm14, %vm724_vm11 }
  0x99   :  { %v668_v34 = vpop.permute.xlu0 %230  ;;  %v116_v7 = vmul.f32 %v114_v22, %v110_v57  ;;  %v183_v22 = vmul.f32 %v173_v10, %v634_v4 }
  0x9a   :  { %v123_v32 = vpop.permute.xlu1 %122 }
  0x9b   :  { %v126_v62 = vsel %vm124_vm7, %v123_v32, %v121_v28  ;;  %v125_v3 = vsel %vm124_vm7, %v121_v28, %v123_v32  ;;  %v188_v51 = vcombine.high %v183_v22, %v184_v27 }
  0x9c   :  { %v133_v12 = vsel %vm714_vm10, %v126_v62, 0.0  ;;  %v134_v16 = vsel %vm724_vm11, %v125_v3, 0.0 }
  0x9d   :  { %v139_v20 = vmul.f32 %v658_v21, %v133_v12  ;;  %v140_v28 = vmul.f32 %v658_v21, %v134_v16  ;;  %v800_v16 = vsub.s32 3, %v682_v48 }
  0x9e   :  { %v144_v35 = vpop.permute.xlu1 %143  ;;  %v93_v44 = vpop.permute.xlu0 %92 }
  0x9f   :  { %v95_v63 = vmul.f32 %v93_v44, %v88_v58  ;;  %v96_v8 = vmul.f32 %v93_v44, %v89_v6  ;;  %v187_v44 = vcombine.low %v183_v22, %v184_v27 }
  0xa1   :  { %v118_v17 = vadd.f32 %v116_v7, %v95_v63  ;;  %v119_v23 = vadd.f32 %v117_v15, %v96_v8  ;;  %v352_v15 = vsub.s32 5, %v682_v48 }
  0xa2   :  { %v146_v42 = vpop.permute.xlu1 %145  ;;  %v196_v59 = vpop.permute.xlu0 %195 }
  0xa3   :  { %v149_v0 = vsel %vm147_vm8, %v146_v42, %v144_v35  ;;  %v148_v9 = vsel %vm147_vm8, %v144_v35, %v146_v42  ;;  %v141_v31 = vadd.f32 %v139_v20, %v118_v17  ;;  %v142_v4 = vadd.f32 %v140_v28, %v119_v23 }
  0xa4   :  { %v154_v13 = vsel %vm677_vm4, %v149_v0, 0.0  ;;  %v155_v18 = vsel %vm702_vm9, %v148_v9, 0.0 }
  0xa5   :  { %v160_v24 = vmul.f32 %v662_v26, %v154_v13  ;;  %v161_v32 = vmul.f32 %v662_v26, %v155_v18 }
  0xa6   :  { %v684_v49 = vpop.permute.xlu1 %251  ;;  %v215_v19 = vpop.permute.xlu0 %214 }
  0xa7   :  { %v162_v5 = vadd.f32 %v160_v24, %v141_v31  ;;  %v163_v45 = vadd.f32 %v161_v32, %v142_v4  ;;  %v400_v4 = vsub.s32 6, %v682_v48 }
  0xa9   :  { %v191_v53 = vadd.f32 %v187_v44, %v162_v5  ;;  %v192_v58 = vadd.f32 %v188_v51, %v163_v45 }
  0xaa   :  { %v194_v60 = vpop.permute.xlu1 %193  ;;  %v238_v40 = vpop.permute.xlu0 %237 }
  0xab   :  { %v198_v25 = vsel %vm197_vm12, %v194_v60, %v196_v59  ;;  %v199_v35 = vsel %vm197_vm12, %v196_v59, %v194_v60 }
  0xac   :  { %v204_v38 = vsel %vm694_vm6, %v198_v25, 0.0  ;;  %v205_v39 = vsel %vm724_vm11, %v199_v35, 0.0 }
  0xad   :  { %v210_v46 = vmul.f32 %v664_v30, %v204_v38  ;;  %v211_v54 = vmul.f32 %v664_v30, %v205_v39  ;;  %v396_v38 = vsub.s32 2, %v682_v48 }
  0xae   :  { %v275_v14 = vpop.permute.xlu1 %274 }
  0xaf   :  { %v212_v59 = vadd.f32 %v210_v46, %v191_v53  ;;  %v213_v61 = vadd.f32 %v211_v54, %v192_v58 }
  0xb2   :  { %v217_v29 = vpop.permute.xlu1 %216 }
  0xb3   :  { %v219_v36 = vsel %vm218_vm13, %v215_v19, %v217_v29  ;;  %v220_v26 = vsel %vm218_vm13, %v217_v29, %v215_v19  ;;  %v300_v19 = vsub.s32 0, %v682_v48 }
  0xb4   :  { %v227_v41 = vsel %vm677_vm4, %v219_v36, 0.0  ;;  %v228_v50 = vsel %vm766_vm0, %v220_v26, 0.0 }
  0xb5   :  { %v233_v55 = vmul.f32 %v668_v34, %v227_v41  ;;  %v234_v60 = vmul.f32 %v668_v34, %v228_v50 }
  0xb6   :  { %v240_v42 = vpop.permute.xlu1 %239 }
  0xb7   :  { %v243_v47 = vsel %vm241_vm15, %v240_v42, %v238_v40  ;;  %v242_v43 = vsel %vm241_vm15, %v238_v40, %v240_v42  ;;  %v235_v62 = vadd.f32 %v233_v55, %v212_v59  ;;  %v236_v1 = vadd.f32 %v234_v60, %v213_v61 }
  0xb8   :  { %v249_v56 = vsel %vm53_vm14, %v243_v47, 0.0  ;;  %v254_v63 = vmul.f32 %v684_v49, %v242_v43 }
  0xb9   :  { %v255_v30 = vmul.f32 %v684_v49, %v249_v56  ;;  %v284_v49 = vpop.permute.xlu0 %283 }
  0xba   :  { %v259_v57 = vpop.permute.xlu1 %258  ;;  %v256_v33 = vadd.f32 %v254_v63, %v235_v62 }
  0xbb   :  { %v257_v8 = vadd.f32 %v255_v30, %v236_v1 }
  0xbd   :  { %v296_v5 = vpop.permute.xlu0 %295 }
  0xbe   :  { %v261_v0 = vpop.permute.xlu1 %260 }
  0xbf   :  { %v263_v3 = vsel %vm262_vm1, %v259_v57, %v261_v0  ;;  %v264_v6 = vsel %vm262_vm1, %v261_v0, %v259_v57 }
  0xc0   :  { %v271_v34 = vsel %vm694_vm6, %v263_v3, 0.0  ;;  %v272_v7 = vsel %vm266_vm2, %v264_v6, 0.0 }
  0xc1   :  { %v277_v9 = vmul.f32 %v275_v14, %v271_v34  ;;  %v278_v10 = vmul.f32 %v275_v14, %v272_v7  ;;  %v304_v14 = vsub.s32 4, %v682_v48  ;;  %v392_v60 = vpop.permute.xlu0 %391 }
  0xc2   :  { %v344_v21 = vpop.permute.xlu1 %343 }
  0xc3   :  { %v279_v11 = vadd.f32 %v277_v9, %v256_v33  ;;  %v280_v12 = vadd.f32 %v278_v10, %v257_v8 }
  0xc5   :  { %v286_v13 = vadd.f32 %v284_v49, %v279_v11  ;;  %v287_v2 = vadd.f32 %v284_v49, %v280_v12 }
  0xc7   :  { %v290_v17 = vcombine.low %v286_v13, %v287_v2  ;;  %v291_v18 = vcombine.high %v286_v13, %v287_v2  ;;  %v440_v0 = vpop.permute.xlu1 %439 }
  0xc9   :  { %v349_v20 = vrot.slane %v290_v17, %v348_v37  ;;  %v353_v23 = vrot.slane %v290_v17, %v352_v15  ;;  %v357_v24 = vrot.slane %v291_v18, %v348_v37  ;;  %v361_v25 = vrot.slane %v291_v18, %v352_v15 }
  0xca   :  { %v445_v22 = vrot.slane %v290_v17, %v800_v16  ;;  %v449_v27 = vrot.slane %v290_v17, %v448_v52  ;;  %v453_v28 = vrot.slane %v291_v18, %v800_v16  ;;  %v457_v29 = vrot.slane %v291_v18, %v448_v52 }
  0xcb   :  { %v369_v31 = vrot.slane %v349_v20, %v348_v37  ;;  %v373_v32 = vrot.slane %v353_v23, %v348_v37  ;;  %v377_v35 = vrot.slane %v357_v24, %v348_v37  ;;  %v381_v36 = vrot.slane %v361_v25, %v348_v37 }
  0xcc   :  { %v465_v26 = vrot.slane %v445_v22, %v800_v16  ;;  %v469_v39 = vrot.slane %v449_v27, %v800_v16  ;;  %v473_v40 = vrot.slane %v453_v28, %v800_v16  ;;  %v477_v41 = vrot.slane %v457_v29, %v800_v16 }
  0xcd   :  { %v382_v42 = vmul.f32 %v369_v31, %v344_v21  ;;  %v383_v44 = vmul.f32 %v373_v32, %v344_v21  ;;  %v384_v45 = vmul.f32 %v377_v35, %v344_v21  ;;  %v385_v46 = vmul.f32 %v381_v36, %v344_v21 }
  0xce   :  { %v301_v47 = vrot.slane %v290_v17, %v300_v19  ;;  %v305_v50 = vrot.slane %v290_v17, %v304_v14  ;;  %v309_v51 = vrot.slane %v291_v18, %v300_v19  ;;  %v313_v53 = vrot.slane %v291_v18, %v304_v14 }
  0xcf   :  { %v397_v54 = vrot.slane %v290_v17, %v396_v38  ;;  %v401_v48 = vrot.slane %v290_v17, %v400_v4  ;;  %v405_v55 = vrot.slane %v291_v18, %v396_v38  ;;  %v409_v43 = vrot.slane %v291_v18, %v400_v4 }
  0xd0   :  { %v321_v56 = vrot.slane %v301_v47, %v300_v19  ;;  %v325_v57 = vrot.slane %v305_v50, %v300_v19  ;;  %v329_v58 = vrot.slane %v309_v51, %v300_v19  ;;  %v333_v59 = vrot.slane %v313_v53, %v300_v19  ;;  %v490_v19 = vpop.permute.xlu1 %489 }
  0xd1   :  { %v417_v61 = vrot.slane %v397_v54, %v396_v38  ;;  %v421_v62 = vrot.slane %v401_v48, %v396_v38  ;;  %v425_v63 = vrot.slane %v405_v55, %v396_v38  ;;  %v429_v30 = vrot.slane %v409_v43, %v396_v38 }
  0xd2   :  { %v334_v1 = vmul.f32 %v321_v56, %v296_v5  ;;  %v335_v3 = vmul.f32 %v325_v57, %v296_v5  ;;  %v336_v6 = vmul.f32 %v329_v58, %v296_v5  ;;  %v337_v34 = vmul.f32 %v333_v59, %v296_v5 }
  0xd3   :  { %v430_v7 = vmul.f32 %v417_v61, %v392_v60  ;;  %v431_v33 = vmul.f32 %v421_v62, %v392_v60  ;;  %v432_v8 = vmul.f32 %v425_v63, %v392_v60  ;;  %v433_v9 = vmul.f32 %v429_v30, %v392_v60 }
  0xd4   :  { %v386_v10 = vadd.f32 %v382_v42, %v334_v1  ;;  %v387_v11 = vadd.f32 %v383_v44, %v335_v3  ;;  %v388_v12 = vadd.f32 %v384_v45, %v336_v6  ;;  %v389_v49 = vadd.f32 %v385_v46, %v337_v34 }
  0xd5   :  { %v478_v13 = vmul.f32 %v465_v26, %v440_v0  ;;  %v479_v2 = vmul.f32 %v469_v39, %v440_v0  ;;  %v480_v37 = vmul.f32 %v473_v40, %v440_v0  ;;  %v481_v15 = vmul.f32 %v477_v41, %v440_v0 }
  0xd6   :  { %v434_v16 = vadd.f32 %v430_v7, %v386_v10  ;;  %v435_v52 = vadd.f32 %v431_v33, %v387_v11  ;;  %v436_v17 = vadd.f32 %v432_v8, %v388_v12  ;;  %v437_v18 = vadd.f32 %v433_v9, %v389_v49 }
  0xd8   :  { %v482_v14 = vadd.f32 %v478_v13, %v434_v16  ;;  %v483_v20 = vadd.f32 %v479_v2, %v435_v52  ;;  %v484_v23 = vadd.f32 %v480_v37, %v436_v17  ;;  %v485_v24 = vadd.f32 %v481_v15, %v437_v18 }
  0xda   :  { %v492_v25 = vadd.f32 %v490_v19, %v482_v14  ;;  %v493_v22 = vadd.f32 %v490_v19, %v483_v20  ;;  %v494_v27 = vadd.f32 %v490_v19, %v484_v23  ;;  %v495_v28 = vadd.f32 %v490_v19, %v485_v24 }
  0xdc   :  { %496 = vst [vmem:[#allocation2] sm:$0xff] %v492_v25  ;;  %497 = vst [vmem:[#allocation2 + $0x8] sm:$0xff] %v493_v22 }
  0xdd   :  { %498 = vst [vmem:[#allocation2 + $0x10] sm:$0xff] %v494_v27  ;;  %499 = vst [vmem:[#allocation2 + $0x18] sm:$0xff] %v495_v28 }
  0xde   :  { %564 = shalt.err (!%p561_p4)
}
  0xdf   :  { %s565_s13 = scalar_lea.hbm %s831_s5, 512 }
  0xe0   :  { %p566_p5 = scmp.ne.s32.totalorder %s831_s5, %s565_s13  ;;  %p569_p6 = scmp.lt.u32.totalorder %s565_s13, %s831_s5 }
  0xe2   :  { %p571_p7 = pnand %p569_p6, %p566_p5 }
  0xe4   :  { %574 = shalt.err (!%p571_p7)
}
  0xe5   :  { %s597_s18 = smov 256  }
  0xe6   :  { %511 = dma.vmem_to_hbm [thread:$0]  %s506_s4, 512, %s831_s5, [#allocation3], %s597_s18, %s597_s18, %s582_s24  }
  0xe7   :  { %575 = dma.done.wait [#allocation3], 512  }
  0xe8   :  { %576 = vsyncadd [#allocation3], 4294966784 }
  0xe9   :  { %515 = vsyncpa [#allocation3], 1 }

</bundles_post_ra>
